<compile_context>
chip_gen: v7x
topology: tpu7x:2x2x1
jax: 0.10.0
libtpu: 0.0.40
codegen_flags: <defaults>
</compile_context>

<pallas_src>
import math

import jax
import jax.numpy as jnp
import numpy as np
from jax.experimental import pallas as pl
from jax.experimental.pallas import tpu as pltpu


def _make_kernel(num_heads, head_dim, compute_dtype):
    nh, hd = num_heads, head_dim
    cdt = compute_dtype

    def kernel(x_ref, w1t_ref, b1_ref, wqkv_ref, bqkv_ref, wot_ref, bo_ref,
               w2t_ref, b2_ref, oma_ref, o_ref, ctx_ref):
        E = w1t_ref.shape[1]

        x = x_ref[...]                                           # (L, H) f32

        # l1:  h = x @ W1^T + b1   (one lane-dense GEMM, K = H)
        h = jax.lax.dot_general(
            x.astype(cdt), w1t_ref[...], (((1,), (0,)), ((), ())),
            preferred_element_type=jnp.float32) + b1_ref[...]    # (L, E) f32

        # Packed QKV projection: ONE GEMM against the (E, 3E) weight slab.
        # 1/sqrt(head_dim) is already folded into the q columns host-side.
        qkv = jax.lax.dot_general(
            h.astype(cdt), wqkv_ref[...], (((1,), (0,)), ((), ())),
            preferred_element_type=jnp.float32) + bqkv_ref[...]  # (L, 3E) f32

        # Per-head attention: exactly L x L work per head, no batch mask
        # (each grid step holds one batch element).  Softmax stays in f32.
        for hsel in range(nh):
            lo, hi = hsel * hd, (hsel + 1) * hd
            q_h = qkv[:, 0 * E + lo: 0 * E + hi].astype(cdt)     # (L, hd)
            k_h = qkv[:, 1 * E + lo: 1 * E + hi].astype(cdt)
            v_h = qkv[:, 2 * E + lo: 2 * E + hi].astype(cdt)

            logits = jax.lax.dot_general(                        # q_h @ k_h^T
                q_h, k_h, (((1,), (1,)), ((), ())),
                preferred_element_type=jnp.float32)              # (L, L) f32
            m = jnp.max(logits, axis=-1, keepdims=True)
            p = jnp.exp(logits - m)
            p = p * pl.reciprocal(jnp.sum(p, axis=-1, keepdims=True),
                                  approx=True)                   # EUP slot

            ctx_h = jax.lax.dot_general(                         # p @ v_h
                p.astype(cdt), v_h, (((1,), (0,)), ((), ())),
                preferred_element_type=jnp.float32)              # (L, hd) f32
            ctx_ref[:, lo:hi] = ctx_h            # repack heads lane-contiguous

        # Out-projection: ONE GEMM with K = E over the repacked context.
        # alpha = sigmoid(gate) is already folded into Wo / bo host-side.
        attn = jax.lax.dot_general(
            ctx_ref[...].astype(cdt), wot_ref[...], (((1,), (0,)), ((), ())),
            preferred_element_type=jnp.float32) + bo_ref[...]    # (L, E) f32

        one_minus_alpha = oma_ref[0, 0]                          # SMEM scalar
        blend = attn + one_minus_alpha * h                       # f32

        # l2 + bias + residual (all f32 except the GEMM operands).
        out = jax.lax.dot_general(
            blend.astype(cdt), w2t_ref[...], (((1,), (0,)), ((), ())),
            preferred_element_type=jnp.float32)                  # (L, H) f32
        o_ref[...] = out + b2_ref[...] + x

    return kernel


def bishare_adapter_pallas(x_lnh, params, num_heads, *,
                           compute_dtype=jnp.bfloat16):
    """x_lnh: (L, N, H) in the PyTorch nn.MultiheadAttention convention.

    Grid iterates over batch elements (one per step); independent steps are
    marked "parallel" so v7x shards them across both TensorCores and BlockSpec
    double-buffering overlaps the x / out HBM traffic with compute.
    """
    (w1, b1, wq, bq, wk, bk, wv, bv, wo, bo, w2, b2, gate) = params
    L, N, H = x_lnh.shape
    E = H // 2
    nh = num_heads
    hd = E // nh
    assert E % nh == 0
    assert L % 8 == 0, "sequence length must be sublane aligned"

    f32 = jnp.float32
    cdt = compute_dtype

    # (L, N, H) -> batch-major rows (N*L, H); pure host-side layout plumbing.
    x2d = jnp.transpose(x_lnh, (1, 0, 2)).reshape(N * L, H).astype(f32)

    scale = 1.0 / math.sqrt(hd)
    alpha = jax.nn.sigmoid(gate.astype(f32))[0, 0]

    # Packed, pre-transposed (in, out) QKV weights; q scaled by 1/sqrt(hd).
    wqkv = jnp.concatenate(
        [wq.astype(f32).T * scale, wk.astype(f32).T, wv.astype(f32).T],
        axis=1).astype(cdt)                                      # (E, 3E)
    bqkv = jnp.concatenate(
        [bq.astype(f32).reshape(1, E) * scale,
         bk.astype(f32).reshape(1, E),
         bv.astype(f32).reshape(1, E)], axis=1)                  # (1, 3E) f32

    # Out-projection pre-scaled by alpha (gate folded away).
    wot = (alpha * wo.astype(f32)).T.astype(cdt)                 # (E, E)
    bo_s = (alpha * bo.astype(f32)).reshape(1, E)                # (1, E) f32

    w1t = w1.astype(f32).T.astype(cdt)                           # (H, E)
    b1r = b1.astype(f32).reshape(1, E)
    w2t = w2.astype(f32).T.astype(cdt)                           # (E, H)
    b2r = b2.astype(f32).reshape(1, H)
    oma = (1.0 - alpha).reshape(1, 1)                            # SMEM scalar

    def const(shape):
        nd = len(shape)
        return pl.BlockSpec(shape, lambda i, _nd=nd: (0,) * _nd)

    out2d = pl.pallas_call(
        _make_kernel(nh, hd, cdt),
        out_shape=jax.ShapeDtypeStruct((N * L, H), f32),
        grid_spec=pltpu.PrefetchScalarGridSpec(
            num_scalar_prefetch=0,
            grid=(N,),                                  # one batch elem / step
            in_specs=[
                pl.BlockSpec((L, H), lambda i: (i, 0)),     # x rows of batch i
                const((H, E)), const((1, E)),               # l1 (transposed)
                const((E, 3 * E)), const((1, 3 * E)),       # packed qkv
                const((E, E)), const((1, E)),               # out-proj (alpha)
                const((E, H)), const((1, H)),               # l2 (transposed)
                pl.BlockSpec(memory_space=pltpu.MemorySpace.SMEM),  # 1 - alpha
            ],
            out_specs=pl.BlockSpec((L, H), lambda i: (i, 0)),
            scratch_shapes=[pltpu.VMEM((L, E), jnp.float32)],   # repacked ctx
        ),
        compiler_params=pltpu.CompilerParams(
            dimension_semantics=("parallel",)),
    )(x2d, w1t, b1r, wqkv, bqkv, wot, bo_s, w2t, b2r, oma)

    return jnp.transpose(out2d.reshape(N, L, H), (1, 0, 2))     # back to (L,N,H)


def init_params(key, H, num_heads):
    E = H // 2
    ks = jax.random.split(key, 12)

    def w(k, shape):
        return jax.random.normal(k, shape, jnp.float32) * 0.05

    w1 = w(ks[0], (E, H)); b1 = w(ks[1], (1, E))
    wq = w(ks[2], (E, E)); bq = w(ks[3], (1, E))
    wk = w(ks[4], (E, E)); bk = w(ks[5], (1, E))
    wv = w(ks[6], (E, E)); bv = w(ks[7], (1, E))
    wo = w(ks[8], (E, E)); bo = w(ks[9], (1, E))
    w2 = w(ks[10], (H, E)); b2 = w(ks[11], (1, H))
    gate = jnp.full((1, 1), 0.6, jnp.float32)
    return (w1, b1, wq, bq, wk, bk, wv, bv, wo, bo, w2, b2, gate)


def reference(x_lnh, params, num_heads):
    """Pure-JAX f32 reference matching PyTorch BiShareAdapter.forward."""
    (w1, b1, wq, bq, wk, bk, wv, bv, wo, bo, w2, b2, gate) = params
    L, N, H = x_lnh.shape
    E = H // 2
    hd = E // num_heads
    h = x_lnh @ w1.T + b1[0]
    q = h @ wq.T + bq[0]
    k = h @ wk.T + bk[0]
    v = h @ wv.T + bv[0]
    scale = 1.0 / math.sqrt(hd)
    qh = (q * scale).reshape(L, N, num_heads, hd)
    kh = k.reshape(L, N, num_heads, hd)
    vh = v.reshape(L, N, num_heads, hd)
    logits = jnp.einsum('qnhd,knhd->nhqk', qh, kh)
    p = jax.nn.softmax(logits, axis=-1)
    ctx = jnp.einsum('nhqk,knhd->qnhd', p, vh).reshape(L, N, E)
    attn_out = ctx @ wo.T + bo[0]
    alpha = jax.nn.sigmoid(gate[0, 0])
    blend = alpha * attn_out + (1.0 - alpha) * h
    return blend @ w2.T + b2[0] + x_lnh


if __name__ == "__main__":
    key = jax.random.PRNGKey(0)
    k_x, k_p = jax.random.split(key)

    L, N, H, num_heads = 8, 2, 32, 4      # seq, batch, hidden_dim, num_heads
    x = jax.random.normal(k_x, (L, N, H), jnp.float32)
    params = init_params(k_p, H, num_heads)

    out = bishare_adapter_pallas(x, params, num_heads)   # bf16 MXU operands
    out = jax.block_until_ready(out)

    ref = reference(x, params, num_heads)
    # bf16 matmul operands (per perf review) -> relaxed tolerance; use
    # compute_dtype=jnp.float32 above for a 1e-4-tight path.
    np.testing.assert_allclose(np.asarray(out), np.asarray(ref),
                               atol=2e-2, rtol=2e-2)
    print("KERNEL_OK")
</pallas_src>

<mosaic_0001>
module attributes {stable_mosaic.version = 11 : i64} {
  func.func @kernel(%arg0: i32, %arg1: memref<8x32xf32, #tpu.memory_space<vmem>>, %arg2: memref<32x16xbf16, #tpu.memory_space<vmem>>, %arg3: memref<1x16xf32, #tpu.memory_space<vmem>>, %arg4: memref<16x48xbf16, #tpu.memory_space<vmem>>, %arg5: memref<1x48xf32, #tpu.memory_space<vmem>>, %arg6: memref<16x16xbf16, #tpu.memory_space<vmem>>, %arg7: memref<1x16xf32, #tpu.memory_space<vmem>>, %arg8: memref<16x32xbf16, #tpu.memory_space<vmem>>, %arg9: memref<1x32xf32, #tpu.memory_space<vmem>>, %arg10: memref<1x1xf32, #tpu.memory_space<smem>>, %arg11: memref<8x32xf32, #tpu.memory_space<vmem>>, %arg12: memref<8x16xf32, #tpu.memory_space<vmem>>) attributes {dimension_semantics = [#tpu.dimension_semantics<parallel>], iteration_bounds = array<i64: 2>, scalar_prefetch = 0 : i64, scratch_operands = 1 : i64, tpu.core_type = #tpu.core_type<tc>, window_params = [{transform_indices = @transform_0, window_bounds = array<i64: 8, 32>}, {pipeline_mode = #tpu.pipeline_mode<synchronous>, transform_indices = @transform_1, window_bounds = array<i64: 32, 16>}, {pipeline_mode = #tpu.pipeline_mode<synchronous>, transform_indices = @transform_2, window_bounds = array<i64: 1, 16>}, {pipeline_mode = #tpu.pipeline_mode<synchronous>, transform_indices = @transform_3, window_bounds = array<i64: 16, 48>}, {pipeline_mode = #tpu.pipeline_mode<synchronous>, transform_indices = @transform_4, window_bounds = array<i64: 1, 48>}, {pipeline_mode = #tpu.pipeline_mode<synchronous>, transform_indices = @transform_5, window_bounds = array<i64: 16, 16>}, {pipeline_mode = #tpu.pipeline_mode<synchronous>, transform_indices = @transform_6, window_bounds = array<i64: 1, 16>}, {pipeline_mode = #tpu.pipeline_mode<synchronous>, transform_indices = @transform_7, window_bounds = array<i64: 16, 32>}, {pipeline_mode = #tpu.pipeline_mode<synchronous>, transform_indices = @transform_8, window_bounds = array<i64: 1, 32>}, {transform_indices = @transform_9, window_bounds = array<i64: 1, 1>}, {transform_indices = @transform_10, window_bounds = array<i64: 8, 32>}]} {
    %c0 = arith.constant 0 : index
    %c0_0 = arith.constant 0 : index
    %0 = vector.load %arg1[%c0, %c0_0] : memref<8x32xf32, #tpu.memory_space<vmem>>, vector<8x32xf32>
    %1 = arith.truncf %0 : vector<8x32xf32> to vector<8x32xbf16>
    %c0_1 = arith.constant 0 : index
    %c0_2 = arith.constant 0 : index
    %2 = vector.load %arg2[%c0_1, %c0_2] : memref<32x16xbf16, #tpu.memory_space<vmem>>, vector<32x16xbf16>
    %cst = arith.constant dense<0.000000e+00> : vector<8x16xf32>
    %3 = tpu.matmul %1, %2, %cst {dimension_numbers = #tpu.dot_dimension_numbers<[1], [0], [0], [1], [0, 0, 1, 1], [], []>} : vector<8x32xbf16>, vector<32x16xbf16>, vector<8x16xf32> -> vector<8x16xf32>
    %c0_3 = arith.constant 0 : index
    %c0_4 = arith.constant 0 : index
    %4 = vector.load %arg3[%c0_3, %c0_4] : memref<1x16xf32, #tpu.memory_space<vmem>>, vector<1x16xf32>
    %5 = vector.broadcast %4 : vector<1x16xf32> to vector<8x16xf32>
    %6 = arith.addf %3, %5 : vector<8x16xf32>
    %7 = arith.truncf %6 : vector<8x16xf32> to vector<8x16xbf16>
    %c0_5 = arith.constant 0 : index
    %c0_6 = arith.constant 0 : index
    %8 = vector.load %arg4[%c0_5, %c0_6] : memref<16x48xbf16, #tpu.memory_space<vmem>>, vector<16x48xbf16>
    %cst_7 = arith.constant dense<0.000000e+00> : vector<8x48xf32>
    %9 = tpu.matmul %7, %8, %cst_7 {dimension_numbers = #tpu.dot_dimension_numbers<[1], [0], [0], [1], [0, 0, 1, 1], [], []>} : vector<8x16xbf16>, vector<16x48xbf16>, vector<8x48xf32> -> vector<8x48xf32>
    %c0_8 = arith.constant 0 : index
    %c0_9 = arith.constant 0 : index
    %10 = vector.load %arg5[%c0_8, %c0_9] : memref<1x48xf32, #tpu.memory_space<vmem>>, vector<1x48xf32>
    %11 = vector.broadcast %10 : vector<1x48xf32> to vector<8x48xf32>
    %12 = arith.addf %9, %11 : vector<8x48xf32>
    %13 = vector.extract_strided_slice %12 {offsets = [0, 0], sizes = [8, 4], strides = [1, 1]} : vector<8x48xf32> to vector<8x4xf32>
    %14 = arith.truncf %13 : vector<8x4xf32> to vector<8x4xbf16>
    %15 = vector.extract_strided_slice %12 {offsets = [0, 16], sizes = [8, 4], strides = [1, 1]} : vector<8x48xf32> to vector<8x4xf32>
    %16 = arith.truncf %15 : vector<8x4xf32> to vector<8x4xbf16>
    %17 = vector.extract_strided_slice %12 {offsets = [0, 32], sizes = [8, 4], strides = [1, 1]} : vector<8x48xf32> to vector<8x4xf32>
    %18 = arith.truncf %17 : vector<8x4xf32> to vector<8x4xbf16>
    %cst_10 = arith.constant dense<0.000000e+00> : vector<8x8xf32>
    %19 = tpu.matmul %14, %16, %cst_10 {dimension_numbers = #tpu.dot_dimension_numbers<[1], [1], [0], [0], [0, 0, 1, 0], [], []>} : vector<8x4xbf16>, vector<8x4xbf16>, vector<8x8xf32> -> vector<8x8xf32>
    %cst_11 = arith.constant dense<0xFF800000> : vector<8xf32>
    %20 = vector.multi_reduction <maximumf>, %19, %cst_11 [1] : vector<8x8xf32> to vector<8xf32>
    %21 = vector.shape_cast %20 : vector<8xf32> to vector<8x1xf32>
    %22 = vector.broadcast %21 : vector<8x1xf32> to vector<8x8xf32>
    %23 = arith.subf %19, %22 : vector<8x8xf32>
    %24 = math.exp %23 : vector<8x8xf32>
    %cst_12 = arith.constant dense<0.000000e+00> : vector<8xf32>
    %25 = vector.multi_reduction <add>, %24, %cst_12 [1] : vector<8x8xf32> to vector<8xf32>
    %26 = vector.shape_cast %25 : vector<8xf32> to vector<8x1xf32>
    %27 = tpu.reciprocal %26 {approx = true} : vector<8x1xf32> -> vector<8x1xf32>
    %28 = vector.broadcast %27 : vector<8x1xf32> to vector<8x8xf32>
    %29 = arith.mulf %24, %28 : vector<8x8xf32>
    %30 = arith.truncf %29 : vector<8x8xf32> to vector<8x8xbf16>
    %cst_13 = arith.constant dense<0.000000e+00> : vector<8x4xf32>
    %31 = tpu.matmul %30, %18, %cst_13 {dimension_numbers = #tpu.dot_dimension_numbers<[1], [0], [0], [1], [0, 0, 1, 1], [], []>} : vector<8x8xbf16>, vector<8x4xbf16>, vector<8x4xf32> -> vector<8x4xf32>
    %c0_14 = arith.constant 0 : index
    %c0_15 = arith.constant 0 : index
    %32 = vector.load %arg12[%c0_14, %c0_15] : memref<8x16xf32, #tpu.memory_space<vmem>>, vector<8x4xf32>
    tpu.vector_store %arg12[%c0_14, %c0_15], %31 {strides = array<i32>} : memref<8x16xf32, #tpu.memory_space<vmem>>, vector<8x4xf32>,
    %33 = vector.extract_strided_slice %12 {offsets = [0, 4], sizes = [8, 4], strides = [1, 1]} : vector<8x48xf32> to vector<8x4xf32>
    %34 = arith.truncf %33 : vector<8x4xf32> to vector<8x4xbf16>
    %35 = vector.extract_strided_slice %12 {offsets = [0, 20], sizes = [8, 4], strides = [1, 1]} : vector<8x48xf32> to vector<8x4xf32>
    %36 = arith.truncf %35 : vector<8x4xf32> to vector<8x4xbf16>
    %37 = vector.extract_strided_slice %12 {offsets = [0, 36], sizes = [8, 4], strides = [1, 1]} : vector<8x48xf32> to vector<8x4xf32>
    %38 = arith.truncf %37 : vector<8x4xf32> to vector<8x4xbf16>
    %cst_16 = arith.constant dense<0.000000e+00> : vector<8x8xf32>
    %39 = tpu.matmul %34, %36, %cst_16 {dimension_numbers = #tpu.dot_dimension_numbers<[1], [1], [0], [0], [0, 0, 1, 0], [], []>} : vector<8x4xbf16>, vector<8x4xbf16>, vector<8x8xf32> -> vector<8x8xf32>
    %cst_17 = arith.constant dense<0xFF800000> : vector<8xf32>
    %40 = vector.multi_reduction <maximumf>, %39, %cst_17 [1] : vector<8x8xf32> to vector<8xf32>
    %41 = vector.shape_cast %40 : vector<8xf32> to vector<8x1xf32>
    %42 = vector.broadcast %41 : vector<8x1xf32> to vector<8x8xf32>
    %43 = arith.subf %39, %42 : vector<8x8xf32>
    %44 = math.exp %43 : vector<8x8xf32>
    %cst_18 = arith.constant dense<0.000000e+00> : vector<8xf32>
    %45 = vector.multi_reduction <add>, %44, %cst_18 [1] : vector<8x8xf32> to vector<8xf32>
    %46 = vector.shape_cast %45 : vector<8xf32> to vector<8x1xf32>
    %47 = tpu.reciprocal %46 {approx = true} : vector<8x1xf32> -> vector<8x1xf32>
    %48 = vector.broadcast %47 : vector<8x1xf32> to vector<8x8xf32>
    %49 = arith.mulf %44, %48 : vector<8x8xf32>
    %50 = arith.truncf %49 : vector<8x8xf32> to vector<8x8xbf16>
    %cst_19 = arith.constant dense<0.000000e+00> : vector<8x4xf32>
    %51 = tpu.matmul %50, %38, %cst_19 {dimension_numbers = #tpu.dot_dimension_numbers<[1], [0], [0], [1], [0, 0, 1, 1], [], []>} : vector<8x8xbf16>, vector<8x4xbf16>, vector<8x4xf32> -> vector<8x4xf32>
    %c0_20 = arith.constant 0 : index
    %c4 = arith.constant 4 : index
    %52 = vector.load %arg12[%c0_20, %c4] : memref<8x16xf32, #tpu.memory_space<vmem>>, vector<8x4xf32>
    tpu.vector_store %arg12[%c0_20, %c4], %51 {strides = array<i32>} : memref<8x16xf32, #tpu.memory_space<vmem>>, vector<8x4xf32>,
    %53 = vector.extract_strided_slice %12 {offsets = [0, 8], sizes = [8, 4], strides = [1, 1]} : vector<8x48xf32> to vector<8x4xf32>
    %54 = arith.truncf %53 : vector<8x4xf32> to vector<8x4xbf16>
    %55 = vector.extract_strided_slice %12 {offsets = [0, 24], sizes = [8, 4], strides = [1, 1]} : vector<8x48xf32> to vector<8x4xf32>
    %56 = arith.truncf %55 : vector<8x4xf32> to vector<8x4xbf16>
    %57 = vector.extract_strided_slice %12 {offsets = [0, 40], sizes = [8, 4], strides = [1, 1]} : vector<8x48xf32> to vector<8x4xf32>
    %58 = arith.truncf %57 : vector<8x4xf32> to vector<8x4xbf16>
    %cst_21 = arith.constant dense<0.000000e+00> : vector<8x8xf32>
    %59 = tpu.matmul %54, %56, %cst_21 {dimension_numbers = #tpu.dot_dimension_numbers<[1], [1], [0], [0], [0, 0, 1, 0], [], []>} : vector<8x4xbf16>, vector<8x4xbf16>, vector<8x8xf32> -> vector<8x8xf32>
    %cst_22 = arith.constant dense<0xFF800000> : vector<8xf32>
    %60 = vector.multi_reduction <maximumf>, %59, %cst_22 [1] : vector<8x8xf32> to vector<8xf32>
    %61 = vector.shape_cast %60 : vector<8xf32> to vector<8x1xf32>
    %62 = vector.broadcast %61 : vector<8x1xf32> to vector<8x8xf32>
    %63 = arith.subf %59, %62 : vector<8x8xf32>
    %64 = math.exp %63 : vector<8x8xf32>
    %cst_23 = arith.constant dense<0.000000e+00> : vector<8xf32>
    %65 = vector.multi_reduction <add>, %64, %cst_23 [1] : vector<8x8xf32> to vector<8xf32>
    %66 = vector.shape_cast %65 : vector<8xf32> to vector<8x1xf32>
    %67 = tpu.reciprocal %66 {approx = true} : vector<8x1xf32> -> vector<8x1xf32>
    %68 = vector.broadcast %67 : vector<8x1xf32> to vector<8x8xf32>
    %69 = arith.mulf %64, %68 : vector<8x8xf32>
    %70 = arith.truncf %69 : vector<8x8xf32> to vector<8x8xbf16>
    %cst_24 = arith.constant dense<0.000000e+00> : vector<8x4xf32>
    %71 = tpu.matmul %70, %58, %cst_24 {dimension_numbers = #tpu.dot_dimension_numbers<[1], [0], [0], [1], [0, 0, 1, 1], [], []>} : vector<8x8xbf16>, vector<8x4xbf16>, vector<8x4xf32> -> vector<8x4xf32>
    %c0_25 = arith.constant 0 : index
    %c8 = arith.constant 8 : index
    %72 = vector.load %arg12[%c0_25, %c8] : memref<8x16xf32, #tpu.memory_space<vmem>>, vector<8x4xf32>
    tpu.vector_store %arg12[%c0_25, %c8], %71 {strides = array<i32>} : memref<8x16xf32, #tpu.memory_space<vmem>>, vector<8x4xf32>,
    %73 = vector.extract_strided_slice %12 {offsets = [0, 12], sizes = [8, 4], strides = [1, 1]} : vector<8x48xf32> to vector<8x4xf32>
    %74 = arith.truncf %73 : vector<8x4xf32> to vector<8x4xbf16>
    %75 = vector.extract_strided_slice %12 {offsets = [0, 28], sizes = [8, 4], strides = [1, 1]} : vector<8x48xf32> to vector<8x4xf32>
    %76 = arith.truncf %75 : vector<8x4xf32> to vector<8x4xbf16>
    %77 = vector.extract_strided_slice %12 {offsets = [0, 44], sizes = [8, 4], strides = [1, 1]} : vector<8x48xf32> to vector<8x4xf32>
    %78 = arith.truncf %77 : vector<8x4xf32> to vector<8x4xbf16>
    %cst_26 = arith.constant dense<0.000000e+00> : vector<8x8xf32>
    %79 = tpu.matmul %74, %76, %cst_26 {dimension_numbers = #tpu.dot_dimension_numbers<[1], [1], [0], [0], [0, 0, 1, 0], [], []>} : vector<8x4xbf16>, vector<8x4xbf16>, vector<8x8xf32> -> vector<8x8xf32>
    %cst_27 = arith.constant dense<0xFF800000> : vector<8xf32>
    %80 = vector.multi_reduction <maximumf>, %79, %cst_27 [1] : vector<8x8xf32> to vector<8xf32>
    %81 = vector.shape_cast %80 : vector<8xf32> to vector<8x1xf32>
    %82 = vector.broadcast %81 : vector<8x1xf32> to vector<8x8xf32>
    %83 = arith.subf %79, %82 : vector<8x8xf32>
    %84 = math.exp %83 : vector<8x8xf32>
    %cst_28 = arith.constant dense<0.000000e+00> : vector<8xf32>
    %85 = vector.multi_reduction <add>, %84, %cst_28 [1] : vector<8x8xf32> to vector<8xf32>
    %86 = vector.shape_cast %85 : vector<8xf32> to vector<8x1xf32>
    %87 = tpu.reciprocal %86 {approx = true} : vector<8x1xf32> -> vector<8x1xf32>
    %88 = vector.broadcast %87 : vector<8x1xf32> to vector<8x8xf32>
    %89 = arith.mulf %84, %88 : vector<8x8xf32>
    %90 = arith.truncf %89 : vector<8x8xf32> to vector<8x8xbf16>
    %cst_29 = arith.constant dense<0.000000e+00> : vector<8x4xf32>
    %91 = tpu.matmul %90, %78, %cst_29 {dimension_numbers = #tpu.dot_dimension_numbers<[1], [0], [0], [1], [0, 0, 1, 1], [], []>} : vector<8x8xbf16>, vector<8x4xbf16>, vector<8x4xf32> -> vector<8x4xf32>
    %c0_30 = arith.constant 0 : index
    %c12 = arith.constant 12 : index
    %92 = vector.load %arg12[%c0_30, %c12] : memref<8x16xf32, #tpu.memory_space<vmem>>, vector<8x4xf32>
    tpu.vector_store %arg12[%c0_30, %c12], %91 {strides = array<i32>} : memref<8x16xf32, #tpu.memory_space<vmem>>, vector<8x4xf32>,
    %c0_31 = arith.constant 0 : index
    %c0_32 = arith.constant 0 : index
    %93 = vector.load %arg12[%c0_31, %c0_32] : memref<8x16xf32, #tpu.memory_space<vmem>>, vector<8x16xf32>
    %94 = arith.truncf %93 : vector<8x16xf32> to vector<8x16xbf16>
    %c0_33 = arith.constant 0 : index
    %c0_34 = arith.constant 0 : index
    %95 = vector.load %arg6[%c0_33, %c0_34] : memref<16x16xbf16, #tpu.memory_space<vmem>>, vector<16x16xbf16>
    %cst_35 = arith.constant dense<0.000000e+00> : vector<8x16xf32>
    %96 = tpu.matmul %94, %95, %cst_35 {dimension_numbers = #tpu.dot_dimension_numbers<[1], [0], [0], [1], [0, 0, 1, 1], [], []>} : vector<8x16xbf16>, vector<16x16xbf16>, vector<8x16xf32> -> vector<8x16xf32>
    %c0_36 = arith.constant 0 : index
    %c0_37 = arith.constant 0 : index
    %97 = vector.load %arg7[%c0_36, %c0_37] : memref<1x16xf32, #tpu.memory_space<vmem>>, vector<1x16xf32>
    %98 = vector.broadcast %97 : vector<1x16xf32> to vector<8x16xf32>
    %99 = arith.addf %96, %98 : vector<8x16xf32>
    %c0_38 = arith.constant 0 : index
    %c0_39 = arith.constant 0 : index
    %100 = memref.load %arg10[%c0_38, %c0_39] : memref<1x1xf32, #tpu.memory_space<smem>>
    %101 = vector.broadcast %100 : f32 to vector<8x16xf32>
    %102 = arith.mulf %101, %6 : vector<8x16xf32>
    %103 = arith.addf %99, %102 : vector<8x16xf32>
    %104 = arith.truncf %103 : vector<8x16xf32> to vector<8x16xbf16>
    %c0_40 = arith.constant 0 : index
    %c0_41 = arith.constant 0 : index
    %105 = vector.load %arg8[%c0_40, %c0_41] : memref<16x32xbf16, #tpu.memory_space<vmem>>, vector<16x32xbf16>
    %cst_42 = arith.constant dense<0.000000e+00> : vector<8x32xf32>
    %106 = tpu.matmul %104, %105, %cst_42 {dimension_numbers = #tpu.dot_dimension_numbers<[1], [0], [0], [1], [0, 0, 1, 1], [], []>} : vector<8x16xbf16>, vector<16x32xbf16>, vector<8x32xf32> -> vector<8x32xf32>
    %c0_43 = arith.constant 0 : index
    %c0_44 = arith.constant 0 : index
    %107 = vector.load %arg9[%c0_43, %c0_44] : memref<1x32xf32, #tpu.memory_space<vmem>>, vector<1x32xf32>
    %108 = vector.broadcast %107 : vector<1x32xf32> to vector<8x32xf32>
    %109 = arith.addf %106, %108 : vector<8x32xf32>
    %110 = arith.addf %109, %0 : vector<8x32xf32>
    %c0_45 = arith.constant 0 : index
    %c0_46 = arith.constant 0 : index
    %111 = vector.load %arg11[%c0_45, %c0_46] : memref<8x32xf32, #tpu.memory_space<vmem>>, vector<8x32xf32>
    tpu.vector_store %arg11[%c0_45, %c0_46], %110 {strides = array<i32>} : memref<8x32xf32, #tpu.memory_space<vmem>>, vector<8x32xf32>,
    return
  }
  func.func @transform_0(%arg0: i32) -> (i32, i32) {
    %c0_i32 = arith.constant 0 : i32
    %c0_i32_0 = arith.constant 0 : i32
    return %arg0, %c0_i32 : i32, i32
  }
  func.func @transform_1(%arg0: i32) -> (i32, i32) {
    %c0_i32 = arith.constant 0 : i32
    %c0_i32_0 = arith.constant 0 : i32
    %c0_i32_1 = arith.constant 0 : i32
    return %c0_i32, %c0_i32_0 : i32, i32
  }
  func.func @transform_2(%arg0: i32) -> (i32, i32) {
    %c0_i32 = arith.constant 0 : i32
    %c0_i32_0 = arith.constant 0 : i32
    %c0_i32_1 = arith.constant 0 : i32
    return %c0_i32, %c0_i32_0 : i32, i32
  }
  func.func @transform_3(%arg0: i32) -> (i32, i32) {
    %c0_i32 = arith.constant 0 : i32
    %c0_i32_0 = arith.constant 0 : i32
    %c0_i32_1 = arith.constant 0 : i32
    return %c0_i32, %c0_i32_0 : i32, i32
  }
  func.func @transform_4(%arg0: i32) -> (i32, i32) {
    %c0_i32 = arith.constant 0 : i32
    %c0_i32_0 = arith.constant 0 : i32
    %c0_i32_1 = arith.constant 0 : i32
    return %c0_i32, %c0_i32_0 : i32, i32
  }
  func.func @transform_5(%arg0: i32) -> (i32, i32) {
    %c0_i32 = arith.constant 0 : i32
    %c0_i32_0 = arith.constant 0 : i32
    %c0_i32_1 = arith.constant 0 : i32
    return %c0_i32, %c0_i32_0 : i32, i32
  }
  func.func @transform_6(%arg0: i32) -> (i32, i32) {
    %c0_i32 = arith.constant 0 : i32
    %c0_i32_0 = arith.constant 0 : i32
    %c0_i32_1 = arith.constant 0 : i32
    return %c0_i32, %c0_i32_0 : i32, i32
  }
  func.func @transform_7(%arg0: i32) -> (i32, i32) {
    %c0_i32 = arith.constant 0 : i32
    %c0_i32_0 = arith.constant 0 : i32
    %c0_i32_1 = arith.constant 0 : i32
    return %c0_i32, %c0_i32_0 : i32, i32
  }
  func.func @transform_8(%arg0: i32) -> (i32, i32) {
    %c0_i32 = arith.constant 0 : i32
    %c0_i32_0 = arith.constant 0 : i32
    %c0_i32_1 = arith.constant 0 : i32
    return %c0_i32, %c0_i32_0 : i32, i32
  }
  func.func @transform_9(%arg0: i32) -> (i32, i32) {
    %c0_i32 = arith.constant 0 : i32
    %c0_i32_0 = arith.constant 0 : i32
    %c0_i32_1 = arith.constant 0 : i32
    return %c0_i32, %c0_i32_0 : i32, i32
  }
  func.func @transform_10(%arg0: i32) -> (i32, i32) {
    %c0_i32 = arith.constant 0 : i32
    %c0_i32_0 = arith.constant 0 : i32
    return %arg0, %c0_i32 : i32, i32
  }
}

</mosaic_0001>

<bundles_post_ra>
// kernel: tpu_custom_call.1
= control target key start
LH: loop header
LB: loop body
LE: loop exit
PB: predicated region body
PF: predicated region fallthrough
CT: control target
= control target key end

     0   :  { %s1709_s0 = inlined_call_operand.vmem [shape: f32[16,32], index: 0, kind: input, shape index: {}]   ;;  %s1710_s1 = inlined_call_operand.vmem [shape: bf16[32,16], index: 1, kind: input, shape index: {}]   ;;  %s1711_s2 = inlined_call_operand.vmem [shape: f32[1,16], index: 2, kind: input, shape index: {}]   ;;  %s1712_s3 = inlined_call_operand.vmem [shape: bf16[16,48], index: 3, kind: input, shape index: {}]   ;;  %s1713_s4 = inlined_call_operand.vmem [shape: f32[1,48], index: 4, kind: input, shape index: {}]   ;;  %s1714_s5 = inlined_call_operand.vmem [shape: bf16[16,16], index: 5, kind: input, shape index: {}]   ;;  %s1715_s6 = inlined_call_operand.vmem [shape: f32[1,16], index: 6, kind: input, shape index: {}]   ;;  %s1716_s7 = inlined_call_operand.vmem [shape: bf16[16,32], index: 7, kind: input, shape index: {}]   ;;  %s1717_s8 = inlined_call_operand.vmem [shape: f32[1,32], index: 8, kind: input, shape index: {}]   ;;  %s1718_s9 = inlined_call_operand.<no memory space> [shape: f32[1,1], index: 9, kind: input, shape index: {}]   ;;  %s1719_s10 = inlined_call_operand.hbm [shape: f32[16,32], index: 10, kind: output, shape index: {}]  }
   0x1   :  { %15 = sst [smem:[#allocation3]] %s1718_s9 }
   0x2   :  { %16 = vsyncpa [#allocation5], 0 }
   0x3   :  { %18 = vsyncpa [#allocation5 + $0x1], 0  ;;  %s1491_s15 = smov 0   ;;  %s1493_s16 = smov 0  }
   0x4   :  { %s1495_s17 = smov 0   ;;  %s1497_s18 = smov 0  }
   0x5 LB: > { %s1512_s9 = sadd.s32 4294967295, %s1414_s18   ;;  %s1146_s19 = sadd.s32 4294967294, %s1414_s18   ;;  %s1414_s18 = sphi %s1497_s18, %s1725_s18   ;;  %s1410_s17 = sphi %s1495_s17, %s1724_s17   ;;  %s1406_s16 = sphi %s1493_s16, %s1723_s16   ;;  %s1402_s15 = sphi %s1491_s15, %s1722_s15  }
   0x6   : > { %s1516_s20 = sadd.s32 1, %s1414_s18   ;;  %s246_s21 = sadd.s32 1, %s1410_s17 }
   0x7   : > { %s243_s22 = ssub.s32 %s1414_s18, %s1516_s20  ;;  %p256_p0 = scmp.ne.s32.totalorder %s1410_s17, %s1406_s16 }
   0x8   : > { %p244_p1 = scmp.eq.s32.totalorder %s243_s22, 0  ;;  %p257_p2 = scmp.eq.s32.totalorder %s1512_s9, 1 }
   0x9   : > { %p262_p3 = scmp.ne.s32.totalorder %s1406_s16, %s1402_s15  ;;  %p263_p4 = scmp.eq.s32.totalorder %s1146_s19, 1 }
   0xa   : > { %s1527_s23 = scalar_select %p244_p1, %s1410_s17, %s246_s21  }
   0xb   : > { %p1529_p5 = por %p257_p2, %p256_p0  ;;  %p1533_p6 = por %p263_p4, %p262_p3 }
   0xc   : > { %p1149_p7 = scmp.ge.s32.totalorder %s1414_s18, 1  ;;  %p315_p8 = scmp.lt.s32.totalorder %s1414_s18, 3 }
   0xe   : > { %p316_p9 = pnand %p1149_p7, %p315_p8 }
   0xf   : > { %v1331_v0 = vld [vmem:[%s1710_s1] sm:$0xff] (!%p316_p9)   ;;  %v1416_v1 = vmov (!%p316_p9), 0.0   ;;  %v1332_v2 = vld [vmem:[%s1710_s1 + $0x8] sm:$0xff] (!%p316_p9)   ;;  %vm1417_vm0 = vmmov (!%p316_p9), 0   ;;  %p352_p10 = scmp.lt.s32.totalorder (!%p316_p9), %s1512_s9, 1  ;;  %vm382_vm1 = vcmask (!%p316_p9), 261120  }
  0x10   : > { %319 = sbr.rel (%p316_p9) target bundleno = 1960 (0x7a8), region = 60  ;;  %1202 = vmatprep.subr.bf16.mxu0 (!%p316_p9), %v1416_v1  ;;  %1210 = vmatprep.subr.bf16.mxu1 (!%p316_p9), %v1416_v1  ;;  %v1333_v5 = vld [vmem:[%s1712_s3] sm:$0xff] (!%p316_p9)   ;;  %vm442_vm2 = vcmask (!%p316_p9), 130048   ;;  %s1418_s29 = smov (!%p316_p9), 124   ;;  %vm490_vm3 = vcmask (!%p316_p9), 31744   ;;  %vm537_vm4 = vcmask (!%p316_p9), 64512  }
  0x11   : > { %1203 = vmatpush3.bf16.msra.mxu0 (!%p316_p9), %v1331_v0  ;;  %1206 = vmatprep.mubr.msk.bf16.mxu0 (!%p316_p9), %vm1417_vm0, %v1416_v1  ;;  %v1152_v6 = vld [vmem:[%s1711_s2] ss:$0 sm:$0xff] (!%p316_p9)  ;;  %s1421_s12 = smov (!%p316_p9), 108   ;;  %s1422_s13 = smov (!%p316_p9), 100   ;;  %vm555_vm5 = vcmask (!%p316_p9), 1043456   ;;  %vm714_vm6 = vcmask (!%p316_p9), 64544  }
  0x12   : > { %1204 = vmatprep.subr.bf16.mxu0 (!%p316_p9), %v1416_v1  ;;  %1212 = vmatprep.mubr.msk.bf16.mxu1 (!%p316_p9), %vm1417_vm0, %v1416_v1  ;;  %v1156_v13 = vld [vmem:[%s1713_s4] ss:$0 sm:$0xff] (!%p316_p9)  ;;  %s1424_s19 = smov (!%p316_p9), 116   ;;  %s1425_s21 = smov (!%p316_p9), 92   ;;  %vm830_vm7 = vcmask (!%p316_p9), 97344   ;;  %vm946_vm8 = vcmask (!%p316_p9), 130144  }
  0x13   : > { %1211 = vmatpush3.bf16.msra.mxu1 (!%p316_p9), %v1333_v5  ;;  %s1426_s22 = smov (!%p316_p9), 96   ;;  %s1427_s26 = smov (!%p316_p9), 84  }
  0x14   : > { %1216 = vmatprep.subr.bf16.mxu1 (!%p316_p9), %v1416_v1  ;;  %s1428_s27 = smov (!%p316_p9), 88   ;;  %s1429_s28 = smov (!%p316_p9), 4  }
  0x15   : > { %1205 = vmatpush3.bf16.msra.mxu0 (!%p316_p9), %v1332_v2 }
  0x16   : > { %1222 = vmatprep.subr.bf16.mxu0 (!%p316_p9), %v1416_v1 }
  0x17   : > { %s353_s30 = scalar_select %p352_p10, %s1512_s9, 1 }
  0x19   : > { %s1151_s11 = sshll.u32 %s353_s30, 3  ;;  %s1419_s30 = smov 112  }
  0x1a   : > { %s355_s14 = scalar_lea.vmem %s1709_s0, %s1151_s11  ;;  %s1420_s11 = smov 104  }
  0x1b   : > { %v1558_v3 = vld [vmem:[%s355_s14] sm:$0xff]  ;;  %s1423_s14 = smov 120  }
  0x1c   : > { %v358_v4 = vpack.c.bf16 %v1558_v3, %v1558_v3 }
  0x1e   : > { %1207 = vmatmul.mubr.msk.bf16.vlgmr.msra.gmra.mrb[0].mxu0 %vm382_vm1, %v358_v4 }
  0x1f   : > { %1224 = vmatprep.mubr.msk.bf16.mxu0 %vm1417_vm0, %v1416_v1 }
  0xf1   : > { %v420_v7 = vpop.f32.mrb[0].mxu0 }
  0xf2   : > { %v1572_v8 = vadd.f32 %v1152_v6, %v420_v7  ;;  %v1208_v9 = vpop.f32.mrb[1].mxu0 }
  0xf3   : > { %v423_v10 = vpop.f32.mrb[2].mxu0 }
  0xf4   : > { %v426_v11 = vpack.c.bf16 %v1572_v8, %v1572_v8  ;;  %v1209_v12 = vpop.f32.mrb[3].mxu0 }
  0xf6   : > { %1213 = vmatmul.mubr.msk.bf16.vlgmr.msra.gmra.mrb[0].mxu1 %vm442_vm2, %v426_v11 }
  0xf7   : > { %1218 = vmatprep.mubr.msk.bf16.mxu1 %vm1417_vm0, %v1416_v1 }
 0x1c9   : > { %v480_v14 = vpop.f32.mrb[0].mxu1 }
 0x1ca   : > { %v481_v15 = vadd.f32 %v1156_v13, %v480_v14  ;;  %v1214_v16 = vpop.f32.mrb[1].mxu1 }
 0x1cb   : > { %v483_v17 = vpop.f32.mrb[2].mxu1 }
 0x1cc   : > { %v1582_v18 = vpack.c.bf16 %v481_v15, %v481_v15  ;;  %v1215_v19 = vpop.f32.mrb[3].mxu1 }
 0x1ce   : > { %600 = vrot.lane.b32.xlu1 %v1582_v18, %s1418_s29  ;;  %488 = vrot.lane.b32.xlu0 %v1582_v18, %s1419_s30  ;;  %s1174_s30 = sshll.u32 %s1512_s9, 7 }
 0x1d2   : > { %718 = vrot.lane.b32.xlu1 %v1582_v18, %s1420_s11  ;;  %602 = vrot.lane.b32.xlu0 %v1582_v18, %s1421_s12  ;;  %s1430_s11 = smov 8   ;;  %s1431_s12 = smov 12  }
 0x1d6   : > { %834 = vrot.lane.b32.xlu1 %v1582_v18, %s1422_s13  ;;  %716 = vrot.lane.b32.xlu0 %v1582_v18, %s1423_s14 }
 0x1da   : > { %832 = vrot.lane.b32.xlu0 %v1582_v18, %s1424_s19  ;;  %s1008_s19 = sld [smem:[#allocation3]] }
 0x240   : > { %v489_v20 = vpop.permute.xlu0 %488  ;;  %v601_v23 = vpop.permute.xlu1 %600 }
 0x241   : > { %v495_v21 = vsel %vm490_vm3, %v489_v20, 0 }
 0x242   : > { %1217 = vmatpush3.bf16.xpose.msra.mxu1 %v495_v21 }
 0x243   : > { %1228 = vmatprep.subr.bf16.mxu1 %v1416_v1 }
 0x244   : > { %v603_v22 = vpop.permute.xlu0 %602  ;;  %v719_v25 = vpop.permute.xlu1 %718 }
 0x245   : > { %v608_v24 = vsel %vm490_vm3, %v603_v22, 0  ;;  %v724_v26 = vsel %vm490_vm3, %v719_v25, 0 }
 0x248   : > { %v835_v27 = vpop.permute.xlu1 %834  ;;  %v717_v28 = vpop.permute.xlu0 %716 }
 0x249   : > { %1219 = vmatmul.mubr.msk.bf16.vlgmr.msra.gmra.mrb[4].mxu1 %vm490_vm3, %v1582_v18  ;;  %v840_v29 = vsel %vm490_vm3, %v835_v27, 0 }
 0x24a   : > { %1229 = vmatpush3.bf16.xpose.msra.mxu1 %v608_v24  ;;  %1230 = vmatprep.mubr.msk.bf16.mxu1 %vm1417_vm0, %v1416_v1 }
 0x24b   : > { %1240 = vmatprep.subr.bf16.mxu1 %v1416_v1 }
 0x24c   : > { %v833_v30 = vpop.permute.xlu0 %832 }
 0x251   : > { %1231 = vmatmul.mubr.msk.bf16.vlgmr.msra.gmra.mrb[8].mxu1 %vm490_vm3, %v601_v23 }
 0x252   : > { %1241 = vmatpush3.bf16.xpose.msra.mxu1 %v724_v26  ;;  %1242 = vmatprep.mubr.msk.bf16.mxu1 %vm1417_vm0, %v1416_v1 }
 0x253   : > { %1252 = vmatprep.subr.bf16.mxu1 %v1416_v1 }
 0x259   : > { %1243 = vmatmul.mubr.msk.bf16.vlgmr.msra.gmra.mrb[12].mxu1 %vm490_vm3, %v717_v28 }
 0x25a   : > { %1253 = vmatpush3.bf16.xpose.msra.mxu1 %v840_v29  ;;  %1254 = vmatprep.mubr.msk.bf16.mxu1 %vm1417_vm0, %v1416_v1 }
 0x25b   : > { %1264 = vmatprep.subr.bf16.mxu1 %v1416_v1 }
 0x261   : > { %1255 = vmatmul.mubr.msk.bf16.vlgmr.msra.gmra.mrb[16].mxu1 %vm490_vm3, %v833_v30 }
 0x262   : > { %1266 = vmatprep.mubr.msk.bf16.mxu1 %vm1417_vm0, %v1416_v1 }
 0x31c   : > { %v531_v31 = vpop.f32.mrb[4].mxu1 }
 0x31d   : > { %v1220_v32 = vpop.f32.mrb[5].mxu1  ;;  %v538_v33 = vsel %vm537_vm4, %v531_v31, -inf }
 0x31e   : > { %539 = vmax.xlane.f32.xlu1 %v538_v33  ;;  %v534_v34 = vpop.f32.mrb[6].mxu1 }
 0x31f   : > { %v1221_v35 = vpop.f32.mrb[7].mxu1 }
 0x324   : > { %v644_v36 = vpop.f32.mrb[8].mxu1 }
 0x325   : > { %v1232_v37 = vpop.f32.mrb[9].mxu1  ;;  %v650_v38 = vsel %vm537_vm4, %v644_v36, -inf }
 0x326   : > { %651 = vmax.xlane.f32.xlu0 %v650_v38  ;;  %v647_v39 = vpop.f32.mrb[10].mxu1 }
 0x327   : > { %v1233_v40 = vpop.f32.mrb[11].mxu1 }
 0x32c   : > { %v760_v41 = vpop.f32.mrb[12].mxu1 }
 0x32d   : > { %v1244_v42 = vpop.f32.mrb[13].mxu1  ;;  %v766_v43 = vsel %vm537_vm4, %v760_v41, -inf }
 0x32e   : > { %767 = vmax.xlane.f32.xlu0 %v766_v43  ;;  %v763_v44 = vpop.f32.mrb[14].mxu1  ;;  %v1334_v42 = vld [vmem:[%s1714_s5] sm:$0xff]  }
 0x32f   : > { %v1245_v45 = vpop.f32.mrb[15].mxu1  ;;  %1265 = vmatpush3.bf16.msra.mxu1 %v1334_v42 }
 0x334   : > { %v876_v46 = vpop.f32.mrb[16].mxu1 }
 0x335   : > { %v1256_v47 = vpop.f32.mrb[17].mxu1  ;;  %v882_v48 = vsel %vm537_vm4, %v876_v46, -inf }
 0x336   : > { %883 = vmax.xlane.f32.xlu1 %v882_v48  ;;  %v879_v49 = vpop.f32.mrb[18].mxu1 }
 0x337   : > { %v1257_v50 = vpop.f32.mrb[19].mxu1 }
 0x3ab   : > { %v540_v51 = vpop.xlane.xlu1 %539 }
 0x3ac   : > { %v541_v52 = vsub.f32 %v531_v31, %v540_v51 }
 0x3ae   : > { %v542_v53 = vmul.f32 1.442695, %v541_v52 }
 0x3b0   : > { %1336 = vpow2.f32 %v542_v53 }
 0x3b3   : > { %v652_v54 = vpop.xlane.xlu0 %651 }
 0x3b4   : > { %v653_v55 = vsub.f32 %v644_v36, %v652_v54 }
 0x3b6   : > { %v654_v56 = vmul.f32 1.442695, %v653_v55  ;;  %v1335_v55 = vld [vmem:[%s1716_s7] sm:$0xff]  }
 0x3b8   : > { %1338 = vpow2.f32 %v654_v56  ;;  %v1009_v56 = vstv %s1008_s19  ;;  %s1666_s19 = scalar_lea.hbm %s1719_s10, %s1174_s30 }
 0x3ba   : > { %v1337_v57 = vpop.eup %1336 }
 0x3bb   : > { %v768_v58 = vpop.xlane.xlu0 %767  ;;  %v544_v59 = vsel %vm537_vm4, %v1337_v57, 0.0 }
 0x3bc   : > { %v769_v60 = vsub.f32 %v760_v41, %v768_v58  ;;  %545 = vadd.xlane.f32.xlu0 %v544_v59  ;;  %v1010_v59 = vmul.f32 %v1009_v56, %v1572_v8 }
 0x3be   : > { %v770_v61 = vmul.f32 1.442695, %v769_v60 }
 0x3c0   : > { %1340 = vpow2.f32 %v770_v61 }
 0x3c2   : > { %v1339_v62 = vpop.eup %1338 }
 0x3c3   : > { %v656_v63 = vsel %vm537_vm4, %v1339_v62, 0.0  ;;  %v884_v4 = vpop.xlane.xlu1 %883 }
 0x3c4   : > { %657 = vadd.xlane.f32.xlu1 %v656_v63  ;;  %v885_v5 = vsub.f32 %v876_v46, %v884_v4  ;;  %v1170_v4 = vld [vmem:[%s1717_s8] ss:$0 sm:$0xff] }
 0x3c6   : > { %v886_v6 = vmul.f32 1.442695, %v885_v5 }
 0x3c8   : > { %1342 = vpow2.f32 %v886_v6 }
 0x3ca   : > { %v1341_v0 = vpop.eup %1340 }
 0x3cb   : > { %v772_v2 = vsel %vm537_vm4, %v1341_v0, 0.0 }
 0x3cc   : > { %773 = vadd.xlane.f32.xlu0 %v772_v2 }
 0x3d2   : > { %v1343_v7 = vpop.eup %1342 }
 0x3d3   : > { %v888_v9 = vsel %vm537_vm4, %v1343_v7, 0.0 }
 0x3d5   : > { %662 = vrot.lane.b32.xlu1 %v1582_v18, %s1425_s21 }
 0x3e2   : > { %550 = vrot.lane.b32.xlu0 %v1582_v18, %s1426_s22  ;;  %s1432_s22 = smov [#allocation4]  }
 0x3e6   : > { %894 = vrot.lane.b32.xlu0 %v1582_v18, %s1427_s26  ;;  %s349_s26 = sand.u32 1, %s1406_s16  }
 0x3e7   : > { %s1074_s9 = scalar_lea.sflag [#allocation5], %s349_s26 }
 0x3f9   : > { %889 = vadd.xlane.f32.xlu1 %v888_v9 }
 0x40a   : > { %778 = vrot.lane.b32.xlu1 %v1582_v18, %s1428_s27  ;;  %s1150_s27 = sshll.u32 %s349_s26, 3 }
 0x449   : > { %v546_v10 = vpop.xlane.xlu0 %545 }
 0x44a   : > { %1344 = vrcp.f32 %v546_v10 }
 0x451   : > { %v658_v11 = vpop.xlane.xlu1 %657 }
 0x452   : > { %1346 = vrcp.f32 %v658_v11 }
 0x454   : > { %v1345_v12 = vpop.eup %1344 }
 0x455   : > { %v548_v14 = vmul.f32 %v1345_v12, %v1337_v57  ;;  %v663_v17 = vpop.permute.xlu1 %662  ;;  %v1167_v57 = vld [vmem:[%s1715_s6] ss:$0 sm:$0xff] }
 0x456   : > { %v668_v21 = vsel %vm555_vm5, %v663_v17, 0 }
 0x457   : > { %v549_v19 = vpack.c.bf16 %v548_v14, %v548_v14 }
 0x459   : > { %v774_v13 = vpop.xlane.xlu0 %773 }
 0x45a   : > { %1348 = vrcp.f32 %v774_v13 }
 0x45c   : > { %v1347_v20 = vpop.eup %1346 }
 0x45d   : > { %v551_v15 = vpop.permute.xlu0 %550  ;;  %v660_v18 = vmul.f32 %v1347_v20, %v1339_v62 }
 0x45e   : > { %v557_v16 = vsel %vm555_vm5, %v551_v15, 0 }
 0x45f   : > { %1223 = vmatpush3.bf16.msra.mxu0 %v557_v16  ;;  %v661_v22 = vpack.c.bf16 %v660_v18, %v660_v18 }
 0x460   : > { %1234 = vmatprep.subr.bf16.mxu0 %v1416_v1 }
 0x461   : > { %v895_v28 = vpop.permute.xlu0 %894 }
 0x462   : > { %1225 = vmatmul.mubr.msk.bf16.vlgmr.msra.gmra.mrb[4].mxu0 %vm537_vm4, %v549_v19  ;;  %v900_v30 = vsel %vm555_vm5, %v895_v28, 0 }
 0x463   : > { %1235 = vmatpush3.bf16.msra.mxu0 %v668_v21  ;;  %1236 = vmatprep.mubr.msk.bf16.mxu0 %vm1417_vm0, %v1416_v1 }
 0x464   : > { %1246 = vmatprep.subr.bf16.mxu0 %v1416_v1  ;;  %v1349_v23 = vpop.eup %1348 }
 0x465   : > { %v776_v25 = vmul.f32 %v1349_v23, %v1341_v0 }
 0x467   : > { %v777_v29 = vpack.c.bf16 %v776_v25, %v776_v25 }
 0x46a   : > { %1237 = vmatmul.mubr.msk.bf16.vlgmr.msra.gmra.mrb[8].mxu0 %vm537_vm4, %v661_v22 }
 0x46b   : > { %1248 = vmatprep.mubr.msk.bf16.mxu0 %vm1417_vm0, %v1416_v1 }
 0x486   : > { %v890_v24 = vpop.xlane.xlu1 %889 }
 0x487   : > { %1350 = vrcp.f32 %v890_v24 }
 0x48a   : > { %v779_v26 = vpop.permute.xlu1 %778 }
 0x48b   : > { %v784_v27 = vsel %vm555_vm5, %v779_v26, 0 }
 0x48c   : > { %1247 = vmatpush3.bf16.msra.mxu0 %v784_v27 }
 0x48d   : > { %1258 = vmatprep.subr.bf16.mxu0 %v1416_v1 }
 0x48f   : > { %1249 = vmatmul.mubr.msk.bf16.vlgmr.msra.gmra.mrb[12].mxu0 %vm537_vm4, %v777_v29 }
 0x490   : > { %1259 = vmatpush3.bf16.msra.mxu0 %v900_v30  ;;  %1260 = vmatprep.mubr.msk.bf16.mxu0 %vm1417_vm0, %v1416_v1 }
 0x491   : > { %v1351_v31 = vpop.eup %1350  ;;  %1270 = vmatprep.subr.bf16.mxu0 %v1416_v1 }
 0x492   : > { %v892_v32 = vmul.f32 %v1351_v31, %v1343_v7 }
 0x494   : > { %v893_v33 = vpack.c.bf16 %v892_v32, %v892_v32 }
 0x497   : > { %1261 = vmatmul.mubr.msk.bf16.vlgmr.msra.gmra.mrb[16].mxu0 %vm537_vm4, %v893_v33 }
 0x498   : > { %1272 = vmatprep.mubr.msk.bf16.mxu0 %vm1417_vm0, %v1416_v1  ;;  %1271 = vmatpush3.bf16.msra.mxu0 %v1335_v55 }
 0x535   : > { %v593_v34 = vpop.f32.mrb[4].mxu0 }
 0x536   : > { %599 = vst.msk [vmem:[#allocation2] sm:$0xff] %vm490_vm3, %v593_v34  ;;  %v1226_v35 = vpop.f32.mrb[5].mxu0 }
 0x537   : > { %v596_v36 = vpop.f32.mrb[6].mxu0 }
 0x538   : > { %v1227_v37 = vpop.f32.mrb[7].mxu0 }
 0x53d   : > { %v704_v38 = vpop.f32.mrb[8].mxu0 }
 0x53e   : > { %711 = vrot.lane.b32.xlu1 %v704_v38, %s1429_s28  ;;  %v1238_v39 = vpop.f32.mrb[9].mxu0 }
 0x53f   : > { %v707_v40 = vpop.f32.mrb[10].mxu0 }
 0x540   : > { %v1239_v41 = vpop.f32.mrb[11].mxu0 }
 0x562   : > { %v820_v43 = vpop.f32.mrb[12].mxu0 }
 0x563   : > { %827 = vrot.lane.b32.xlu0 %v820_v43, %s1430_s11  ;;  %v1250_v1 = vpop.f32.mrb[13].mxu0  ;;  %s351_s11 = scalar_lea.vmem [#allocation4], %s1150_s27  ;;  %s1356_s27 = sshll.u32 %s1432_s22, 4  ;;  %s1357_s27 = int_to_ptr.vmem [resolvable:$false] %s1356_s27 }
 0x564   : > { %v823_v44 = vpop.f32.mrb[14].mxu0  ;;  %s1358_s28 = scalar_lea.vmem %s1357_s27, 256 }
 0x565   : > { %v1251_v45 = vpop.f32.mrb[15].mxu0 }
 0x56a   : > { %v936_v46 = vpop.f32.mrb[16].mxu0 }
 0x56b   : > { %943 = vrot.lane.b32.xlu1 %v936_v46, %s1431_s12  ;;  %v1262_v47 = vpop.f32.mrb[17].mxu0  ;;  %s1087_s12 = sshll.u32 %s351_s11, 4  ;;  %s1668_s12 = int_to_ptr.vmem [resolvable:$true] %s1087_s12 }
 0x56c   : > { %v939_v48 = vpop.f32.mrb[18].mxu0  ;;  %s1352_s21 = scalar_lea.vmem %s1668_s12, 128  ;;  %p1359_p0 = scmp.lt.s32.totalorder %s1668_s12, %s1357_s27 }
 0x56d   : > { %v1263_v49 = vpop.f32.mrb[19].mxu0  ;;  %p1353_p11 = scmp.ne.s32.totalorder %s1668_s12, %s1352_s21  ;;  %p1360_p1 = scmp.lt.s32.totalorder %s1358_s28, %s1352_s21 }
 0x56f   : > { %p1354_p12 = pnand %p1353_p11, %p1529_p5  ;;  %p1361_p2 = por %p1360_p1, %p1359_p0 }
 0x571   : > { %p1355_p13 = pneg %p1354_p12 }
 0x573   : > { %p1362_p3 = pnand %p1361_p2, %p1355_p13 }
 0x5b0   : > { %v712_v50 = vpop.permute.xlu1 %711 }
 0x5b1   : > { %715 = vst.msk [vmem:[#allocation2] sm:$0xff] %vm714_vm6, %v712_v50 }
 0x5d5   : > { %v828_v51 = vpop.permute.xlu0 %827 }
 0x5d6   : > { %831 = vst.msk [vmem:[#allocation2] sm:$0xff] %vm830_vm7, %v828_v51 }
 0x5dd   : > { %v944_v52 = vpop.permute.xlu1 %943 }
 0x5de   : > { %947 = vst.msk [vmem:[#allocation2] sm:$0xff] %vm946_vm8, %v944_v52 }
 0x5e5   : > { %v948_v53 = vld [vmem:[#allocation2] sm:$0xff] }
 0x5e6   : > { %v949_v54 = vpack.c.bf16 %v948_v53, %v948_v53 }
 0x5e8   : > { %1267 = vmatmul.mubr.msk.bf16.vlgmr.msra.gmra.mrb[20].mxu1 %vm442_vm2, %v949_v54 }
 0x6bb   : > { %v1002_v58 = vpop.f32.mrb[20].mxu1 }
 0x6bc   : > { %v1003_v60 = vadd.f32 %v1167_v57, %v1002_v58  ;;  %v1268_v61 = vpop.f32.mrb[21].mxu1 }
 0x6bd   : > { %v1005_v62 = vpop.f32.mrb[22].mxu1 }
 0x6be   : > { %v1011_v63 = vadd.f32 %v1010_v59, %v1003_v60  ;;  %v1269_v0 = vpop.f32.mrb[23].mxu1 }
 0x6c0   : > { %v1012_v2 = vpack.c.bf16 %v1011_v63, %v1011_v63 }
 0x6c2   : > { %1273 = vmatmul.mubr.msk.bf16.vlgmr.msra.gmra.mrb[20].mxu0 %vm442_vm2, %v1012_v2 }
 0x795   : > { %v1065_v5 = vpop.f32.mrb[20].mxu0 }
 0x796   : > { %v1066_v8 = vadd.f32 %v1170_v4, %v1065_v5  ;;  %v1274_v6 = vpop.f32.mrb[21].mxu0 }
 0x797   : > { %v1068_v7 = vpop.f32.mrb[22].mxu0 }
 0x798   : > { %v1071_v9 = vadd.f32 %v1066_v8, %v1558_v3  ;;  %v1275_v10 = vpop.f32.mrb[23].mxu0 }
 0x79a   : > { %1072 = vst.msk [vmem:[%s351_s11] sm:$0xff] %vm382_vm1, %v1071_v9 }
 0x79b   : > { %1365 = shalt.err (!%p1362_p3)
}
 0x79c   : > { %s1366_s26 = scalar_lea.hbm %s1666_s19, 128  ;;  %s1370_s11 = scalar_lea.hbm %s1719_s10, 256 }
 0x79d   : > { %p1367_p4 = scmp.ne.s32.totalorder %s1666_s19, %s1366_s26  ;;  %p1371_p9 = scmp.lt.u32.totalorder %s1666_s19, %s1719_s10 }
 0x79e   : > { %p1372_p10 = scmp.lt.u32.totalorder %s1370_s11, %s1366_s26  ;;  %p1374_p12 = scmp.lt.u32.totalorder %s1366_s26, %s1666_s19 }
 0x79f   : > { %p1368_p7 = pnand %p1367_p4, %p1529_p5 }
 0x7a0   : > { %p1373_p11 = por %p1372_p10, %p1371_p9 }
 0x7a1   : > { %p1369_p8 = pneg %p1368_p7 }
 0x7a2   : > { %p1375_p13 = por %p1374_p12, %p1373_p11 }
 0x7a4   : > { %p1376_p0 = pnand %p1375_p13, %p1369_p8 }
 0x7a6   : > { %1379 = shalt.err (!%p1376_p0)
}
 0x7a7   : > { %1276 = dma.vmem_to_hbm [thread:$0]  (%p1529_p5), %s1668_s12, 128, %s1666_s19, %s1074_s9  }
 0x7a8 PF: > { %p1282_p1 = scmp.ge.s32.totalorder %s1414_s18, 2  ;;  %s1099_s21 = sand.u32 1, %s1402_s15  }
 0x7a9   : > { %s1100_s22 = scalar_lea.sflag [#allocation5], %s1099_s21 }
 0x7aa   : > { %p1279_p2 = pnand %p1282_p1, %p1533_p6 }
 0x7ac   : > { %1397 = dma.done.wait (!%p1279_p2), %s1100_s22, 128  }
 0x7ad   : > { %1399 = vsyncadd (!%p1279_p2), %s1100_s22, 4294967168  ;;  %p21_p3 = scmp.ge.s32.totalorder %s1516_s20, 4   ;;  %s1722_s15 = smov %s1406_s16 }
 0x7ae   : > { %s1723_s16 = smov %s1410_s17  ;;  %s1724_s17 = smov %s1527_s23 }
 0x7af   : > { %s1725_s18 = smov %s1516_s20  ;;  %23 = sbr.rel (!%p21_p3) target bundleno = 5 (0x5), region = 95 }
 0x7b6   :  { %1105 = vsyncpa [#allocation5], 1 }
 0x7b7   :  { %1107 = vsyncpa [#allocation5 + $0x1], 1 }

</bundles_post_ra>
